<compile_context>
chip_gen: v7x
topology: tpu7x:2x2x1
jax: 0.10.0
libtpu: 0.0.40
codegen_flags: <defaults>
</compile_context>

<pallas_src>
import functools

import jax
import jax.numpy as jnp
from jax.experimental import pallas as pl
from jax.experimental.pallas import tpu as pltpu

KH = KW = 3          # BasicConv kernel size
C_POOL = 2           # ChannelPool output channels (max, mean)
BN_EPS = 1e-5


def _spatial_gate_kernel(params_ref, x_ref, o_ref, *, H, W):
    # params_ref (SMEM, f32[19]):
    #   [0:18]  BN-folded conv weight, PyTorch OIHW order flattened (1, 2, 3, 3)
    #   [18]    BN-folded conv bias
    # x_ref / o_ref: (TN, C, H*W) lane-dense blocks.
    x = x_ref[...]                                     # (TN, C, HW), input dtype
    TN, C, HW = x.shape

    # --- ChannelPool: max / mean over channels (sublane reduction). ---
    # Max in the input dtype; only the (TN, HW) result is widened.  Mean via a
    # sum-reduce with an f32 accumulator (no full-block f32 copy).
    c_max = jnp.max(x, axis=1).astype(jnp.float32)                 # (TN, HW)
    c_mean = jnp.sum(x, axis=1, dtype=jnp.float32) * (1.0 / C)     # (TN, HW)

    # --- Conv2d(2 -> 1, k=3, s=1, p=1, bias) on the flattened maps. ---
    # Tap (dh, dw) of a flattened map is a cyclic lane roll by dh*W + dw
    # (XLU slot, no concat / unaligned slices); wrapped row/column positions
    # are zeroed with masks hoisted out of the tap loop.
    flat = jax.lax.broadcasted_iota(jnp.int32, (TN, HW), 1)
    col = flat % W
    col_ge_1 = col >= 1               # valid positions for dw = -1
    col_lt_end = col < W - 1          # valid positions for dw = +1
    row_ge_1 = flat >= W              # valid positions for dh = -1
    row_lt_end = flat < (H - 1) * W   # valid positions for dh = +1

    acc = jnp.full((TN, HW), params_ref[C_POOL * KH * KW], dtype=jnp.float32)
    for ci, pooled in enumerate((c_max, c_mean)):
        for kh in range(KH):
            dh = kh - 1
            if dh == 0:
                pv = pooled
            else:
                pv = pltpu.roll(pooled, (-dh * W) % HW, axis=1)
                pv = jnp.where(row_ge_1 if dh < 0 else row_lt_end, pv, 0.0)
            for kw in range(KW):
                dw = kw - 1
                wgt = params_ref[ci * (KH * KW) + kh * KW + kw]
                if dw == 0:
                    tap = pv
                else:
                    tap = pltpu.roll(pv, (-dw) % HW, axis=1)
                    tap = jnp.where(col_ge_1 if dw < 0 else col_lt_end, tap, 0.0)
                acc = acc + wgt * tap

    # --- (BN folded into weight/bias) + ReLU + sigmoid gate. ---
    scale = jax.nn.sigmoid(jnp.maximum(acc, 0.0))      # (TN, HW), f32

    # Gate in f32 and cast once at the store (no-op for f32 inputs; matches the
    # f32 reference for bf16 inputs — the widening pass is hidden under DMA).
    o_ref[...] = (x.astype(jnp.float32) * scale[:, None, :]).astype(o_ref.dtype)


def spatial_gate(x, params, *, block_bytes_target=6 * 1024 * 1024):
    N, C, H, W = x.shape
    HW = H * W
    x2 = x.reshape(N, C, HW)                           # lane-dense, free reshape

    # Generation-aware VMEM ceiling (v7x has only 64 MiB physical VMEM).
    try:
        vmem_cap = int(pltpu.get_tpu_info().vmem_capacity_bytes)
    except Exception:                                  # pragma: no cover
        vmem_cap = 64 << 20                            # conservative default
    vmem_ceiling = min(int(vmem_cap * 4 // 5), 100 << 20)

    # Pack several images per grid step so each DMA block is a few MiB
    # (per-step pipeline overhead ~0.35 us), but keep the grid >= 2 steps when
    # N allows so both v7x TensorCores get work on the "parallel" axis.
    per_image = C * HW * x.dtype.itemsize
    TN = max(1, min(N, block_bytes_target // per_image))
    if N > 1:
        TN = min(TN, pl.cdiv(N, 2))

    # Conservative working-set estimate: double-buffered in/out blocks
    # (C padded to a sublane multiple of 8), an f32 widened copy for non-f32
    # inputs, and the (TN, HW)-sized f32 conv intermediates.
    c_pad = ((C + 7) // 8) * 8

    def vmem_need(tn):
        blk = tn * c_pad * HW * x.dtype.itemsize
        f32_copy = tn * c_pad * HW * 4 if x.dtype != jnp.float32 else 0
        return 4 * blk + f32_copy + 16 * tn * HW * 4 + (4 << 20)

    while TN > 1 and vmem_need(TN) > vmem_ceiling:
        TN = max(1, TN // 2)
    # TODO(synk): a single image bigger than the VMEM budget (huge C*H*W on
    # v7x's 64 MiB) would need an H-tiled path with a 1-row halo.
    # TODO(synk): for C < 8 the (TN, C, HW) block wastes sublane padding; a
    # channel-padded / batch-folded layout would help tiny-C workloads.

    vmem_limit = int(min(max(vmem_need(TN), 32 << 20), vmem_ceiling))

    kernel = functools.partial(_spatial_gate_kernel, H=H, W=W)
    out = pl.pallas_call(
        kernel,
        out_shape=jax.ShapeDtypeStruct((N, C, HW), x.dtype),
        grid_spec=pltpu.PrefetchScalarGridSpec(
            num_scalar_prefetch=0,
            grid=(pl.cdiv(N, TN),),                    # ragged last block OK
            in_specs=[
                pl.BlockSpec(memory_space=pltpu.MemorySpace.SMEM),   # params
                pl.BlockSpec((TN, C, HW), lambda n: (n, 0, 0)),      # x
            ],
            out_specs=pl.BlockSpec((TN, C, HW), lambda n: (n, 0, 0)),
        ),
        compiler_params=pltpu.CompilerParams(
            dimension_semantics=("parallel",),         # batch tiles independent
            vmem_limit_bytes=vmem_limit,
        ),
    )(params, x2)
    return out.reshape(N, C, H, W)


def fold_bn_into_conv(w, b, gamma, beta, rmean, rvar):
    """Fold inference-mode BatchNorm2d into the conv weight/bias (19 scalars)."""
    s = gamma * jax.lax.rsqrt(rvar + BN_EPS)           # (1,)
    w_fused = w * s[:, None, None, None]               # (1, 2, 3, 3)
    b_fused = (b - rmean) * s + beta                   # (1,)
    return jnp.concatenate([w_fused.reshape(-1), b_fused]).astype(jnp.float32)


def spatial_gate_ref(x, w, b, gamma, beta, rmean, rvar):
    """Plain-JAX reference of the same forward pass (for verification)."""
    xf = x.astype(jnp.float32)
    pooled = jnp.concatenate(
        [jnp.max(xf, axis=1, keepdims=True), jnp.mean(xf, axis=1, keepdims=True)],
        axis=1)                                                     # (N, 2, H, W)
    conv = jax.lax.conv_general_dilated(
        pooled, w, window_strides=(1, 1), padding="SAME",
        dimension_numbers=("NCHW", "OIHW", "NCHW")) + b[None, :, None, None]
    y = ((conv - rmean[None, :, None, None])
         * jax.lax.rsqrt(rvar + BN_EPS)[None, :, None, None]
         * gamma[None, :, None, None] + beta[None, :, None, None])
    y = jnp.maximum(y, 0.0)
    return xf * jax.nn.sigmoid(y)


if __name__ == "__main__":
    N, C, H, W = 2, 4, 16, 16
    key = jax.random.PRNGKey(0)
    kx, kw = jax.random.split(key)

    x = jax.random.normal(kx, (N, C, H, W), dtype=jnp.float32)

    # Deterministic synthetic parameters (shapes from the module __init__).
    w = jax.random.normal(kw, (1, 2, 3, 3), dtype=jnp.float32) * 0.2   # Conv2d(2,1,3)
    b = jnp.array([0.05], dtype=jnp.float32)                            # conv bias
    gamma = jnp.array([1.1], dtype=jnp.float32)                         # BN weight
    beta = jnp.array([-0.05], dtype=jnp.float32)                        # BN bias
    rmean = jnp.array([0.02], dtype=jnp.float32)                        # BN running_mean
    rvar = jnp.array([0.9], dtype=jnp.float32)                          # BN running_var

    params = fold_bn_into_conv(w, b, gamma, beta, rmean, rvar)          # (19,)

    out = spatial_gate(x, params)
    out = jax.block_until_ready(out)

    ref = spatial_gate_ref(x, w, b, gamma, beta, rmean, rvar)
    assert out.shape == (N, C, H, W)
    assert jnp.allclose(out, ref, atol=2e-5, rtol=2e-5), float(
        jnp.max(jnp.abs(out - ref)))

    print("KERNEL_OK")
</pallas_src>

<mosaic_0001>
module attributes {stable_mosaic.version = 11 : i64} {
  func.func @_spatial_gate_kernel(%arg0: i32, %arg1: memref<19xf32, #tpu.memory_space<smem>>, %arg2: memref<1x4x256xf32, #tpu.memory_space<vmem>>, %arg3: memref<1x4x256xf32, #tpu.memory_space<vmem>>) attributes {dimension_semantics = [#tpu.dimension_semantics<parallel>], iteration_bounds = array<i64: 2>, scalar_prefetch = 0 : i64, scratch_operands = 0 : i64, tpu.core_type = #tpu.core_type<tc>, window_params = [{transform_indices = @transform_0, window_bounds = array<i64: 19>}, {transform_indices = @transform_1, window_bounds = array<i64: 1, 4, 256>}, {transform_indices = @transform_2, window_bounds = array<i64: 1, 4, 256>}]} {
    %c0 = arith.constant 0 : index
    %c0_0 = arith.constant 0 : index
    %c0_1 = arith.constant 0 : index
    %0 = vector.load %arg2[%c0, %c0_0, %c0_1] : memref<1x4x256xf32, #tpu.memory_space<vmem>>, vector<1x4x256xf32>
    %cst = arith.constant dense<0xFF800000> : vector<1x256xf32>
    %1 = vector.multi_reduction <maximumf>, %0, %cst [1] : vector<1x4x256xf32> to vector<1x256xf32>
    %cst_2 = arith.constant dense<0.000000e+00> : vector<1x256xf32>
    %2 = vector.multi_reduction <add>, %0, %cst_2 [1] : vector<1x4x256xf32> to vector<1x256xf32>
    %cst_3 = arith.constant 2.500000e-01 : f32
    %3 = vector.broadcast %cst_3 : f32 to vector<1x256xf32>
    %4 = arith.mulf %2, %3 : vector<1x256xf32>
    %5 = tpu.iota {dimensions = array<i32: 1>} : vector<1x256xi32>
    %c16_i32 = arith.constant 16 : i32
    %c0_i32 = arith.constant 0 : i32
    %6 = arith.cmpi eq, %c16_i32, %c0_i32 : i32
    %c1_i32 = arith.constant 1 : i32
    %7 = arith.select %6, %c1_i32, %c16_i32 : i32
    %8 = vector.broadcast %7 : i32 to vector<1x256xi32>
    %9 = arith.remsi %5, %8 : vector<1x256xi32>
    %c0_i32_4 = arith.constant 0 : i32
    %10 = vector.broadcast %c0_i32_4 : i32 to vector<1x256xi32>
    %11 = arith.cmpi ne, %9, %10 : vector<1x256xi32>
    %c0_i32_5 = arith.constant 0 : i32
    %12 = vector.broadcast %c0_i32_5 : i32 to vector<1x256xi32>
    %13 = arith.cmpi slt, %9, %12 : vector<1x256xi32>
    %c0_i32_6 = arith.constant 0 : i32
    %14 = arith.cmpi slt, %7, %c0_i32_6 : i32
    %15 = vector.broadcast %14 : i1 to vector<1x256xi1>
    %16 = vector.broadcast %15 : vector<1x256xi1> to vector<1x256xi1>
    %17 = arith.xori %13, %16 : vector<1x256xi1>
    %18 = arith.andi %17, %11 : vector<1x256xi1>
    %19 = vector.broadcast %7 : i32 to vector<1x256xi32>
    %20 = arith.addi %9, %19 : vector<1x256xi32>
    %21 = arith.select %18, %20, %9 : vector<1x256xi1>, vector<1x256xi32>
    %c1_i32_7 = arith.constant 1 : i32
    %22 = vector.broadcast %c1_i32_7 : i32 to vector<1x256xi32>
    %23 = arith.cmpi sge, %21, %22 : vector<1x256xi32>
    %c15_i32 = arith.constant 15 : i32
    %24 = vector.broadcast %c15_i32 : i32 to vector<1x256xi32>
    %25 = arith.cmpi slt, %21, %24 : vector<1x256xi32>
    %c16_i32_8 = arith.constant 16 : i32
    %26 = vector.broadcast %c16_i32_8 : i32 to vector<1x256xi32>
    %27 = arith.cmpi sge, %5, %26 : vector<1x256xi32>
    %c240_i32 = arith.constant 240 : i32
    %28 = vector.broadcast %c240_i32 : i32 to vector<1x256xi32>
    %29 = arith.cmpi slt, %5, %28 : vector<1x256xi32>
    %c18 = arith.constant 18 : index
    %30 = memref.load %arg1[%c18] : memref<19xf32, #tpu.memory_space<smem>>
    %31 = vector.broadcast %30 : f32 to vector<1x256xf32>
    %c16_i32_9 = arith.constant 16 : i32
    %32 = tpu.dynamic_rotate %1 by %c16_i32_9 dim 1 : vector<1x256xf32>, i32 -> vector<1x256xf32>
    %cst_10 = arith.constant 0.000000e+00 : f32
    %33 = vector.broadcast %cst_10 : f32 to vector<1x256xf32>
    %34 = arith.select %27, %32, %33 : vector<1x256xi1>, vector<1x256xf32>
    %c0_11 = arith.constant 0 : index
    %35 = memref.load %arg1[%c0_11] : memref<19xf32, #tpu.memory_space<smem>>
    %c1_i32_12 = arith.constant 1 : i32
    %36 = tpu.dynamic_rotate %34 by %c1_i32_12 dim 1 : vector<1x256xf32>, i32 -> vector<1x256xf32>
    %cst_13 = arith.constant 0.000000e+00 : f32
    %37 = vector.broadcast %cst_13 : f32 to vector<1x256xf32>
    %38 = arith.select %23, %36, %37 : vector<1x256xi1>, vector<1x256xf32>
    %39 = vector.broadcast %35 : f32 to vector<1x256xf32>
    %40 = arith.mulf %39, %38 : vector<1x256xf32>
    %41 = arith.addf %31, %40 : vector<1x256xf32>
    %c1 = arith.constant 1 : index
    %42 = memref.load %arg1[%c1] : memref<19xf32, #tpu.memory_space<smem>>
    %43 = vector.broadcast %42 : f32 to vector<1x256xf32>
    %44 = arith.mulf %43, %34 : vector<1x256xf32>
    %45 = arith.addf %41, %44 : vector<1x256xf32>
    %c2 = arith.constant 2 : index
    %46 = memref.load %arg1[%c2] : memref<19xf32, #tpu.memory_space<smem>>
    %c255_i32 = arith.constant 255 : i32
    %47 = tpu.dynamic_rotate %34 by %c255_i32 dim 1 : vector<1x256xf32>, i32 -> vector<1x256xf32>
    %cst_14 = arith.constant 0.000000e+00 : f32
    %48 = vector.broadcast %cst_14 : f32 to vector<1x256xf32>
    %49 = arith.select %25, %47, %48 : vector<1x256xi1>, vector<1x256xf32>
    %50 = vector.broadcast %46 : f32 to vector<1x256xf32>
    %51 = arith.mulf %50, %49 : vector<1x256xf32>
    %52 = arith.addf %45, %51 : vector<1x256xf32>
    %c3 = arith.constant 3 : index
    %53 = memref.load %arg1[%c3] : memref<19xf32, #tpu.memory_space<smem>>
    %c1_i32_15 = arith.constant 1 : i32
    %54 = tpu.dynamic_rotate %1 by %c1_i32_15 dim 1 : vector<1x256xf32>, i32 -> vector<1x256xf32>
    %cst_16 = arith.constant 0.000000e+00 : f32
    %55 = vector.broadcast %cst_16 : f32 to vector<1x256xf32>
    %56 = arith.select %23, %54, %55 : vector<1x256xi1>, vector<1x256xf32>
    %57 = vector.broadcast %53 : f32 to vector<1x256xf32>
    %58 = arith.mulf %57, %56 : vector<1x256xf32>
    %59 = arith.addf %52, %58 : vector<1x256xf32>
    %c4 = arith.constant 4 : index
    %60 = memref.load %arg1[%c4] : memref<19xf32, #tpu.memory_space<smem>>
    %61 = vector.broadcast %60 : f32 to vector<1x256xf32>
    %62 = arith.mulf %61, %1 : vector<1x256xf32>
    %63 = arith.addf %59, %62 : vector<1x256xf32>
    %c5 = arith.constant 5 : index
    %64 = memref.load %arg1[%c5] : memref<19xf32, #tpu.memory_space<smem>>
    %c255_i32_17 = arith.constant 255 : i32
    %65 = tpu.dynamic_rotate %1 by %c255_i32_17 dim 1 : vector<1x256xf32>, i32 -> vector<1x256xf32>
    %cst_18 = arith.constant 0.000000e+00 : f32
    %66 = vector.broadcast %cst_18 : f32 to vector<1x256xf32>
    %67 = arith.select %25, %65, %66 : vector<1x256xi1>, vector<1x256xf32>
    %68 = vector.broadcast %64 : f32 to vector<1x256xf32>
    %69 = arith.mulf %68, %67 : vector<1x256xf32>
    %70 = arith.addf %63, %69 : vector<1x256xf32>
    %c240_i32_19 = arith.constant 240 : i32
    %71 = tpu.dynamic_rotate %1 by %c240_i32_19 dim 1 : vector<1x256xf32>, i32 -> vector<1x256xf32>
    %cst_20 = arith.constant 0.000000e+00 : f32
    %72 = vector.broadcast %cst_20 : f32 to vector<1x256xf32>
    %73 = arith.select %29, %71, %72 : vector<1x256xi1>, vector<1x256xf32>
    %c6 = arith.constant 6 : index
    %74 = memref.load %arg1[%c6] : memref<19xf32, #tpu.memory_space<smem>>
    %c1_i32_21 = arith.constant 1 : i32
    %75 = tpu.dynamic_rotate %73 by %c1_i32_21 dim 1 : vector<1x256xf32>, i32 -> vector<1x256xf32>
    %cst_22 = arith.constant 0.000000e+00 : f32
    %76 = vector.broadcast %cst_22 : f32 to vector<1x256xf32>
    %77 = arith.select %23, %75, %76 : vector<1x256xi1>, vector<1x256xf32>
    %78 = vector.broadcast %74 : f32 to vector<1x256xf32>
    %79 = arith.mulf %78, %77 : vector<1x256xf32>
    %80 = arith.addf %70, %79 : vector<1x256xf32>
    %c7 = arith.constant 7 : index
    %81 = memref.load %arg1[%c7] : memref<19xf32, #tpu.memory_space<smem>>
    %82 = vector.broadcast %81 : f32 to vector<1x256xf32>
    %83 = arith.mulf %82, %73 : vector<1x256xf32>
    %84 = arith.addf %80, %83 : vector<1x256xf32>
    %c8 = arith.constant 8 : index
    %85 = memref.load %arg1[%c8] : memref<19xf32, #tpu.memory_space<smem>>
    %c255_i32_23 = arith.constant 255 : i32
    %86 = tpu.dynamic_rotate %73 by %c255_i32_23 dim 1 : vector<1x256xf32>, i32 -> vector<1x256xf32>
    %cst_24 = arith.constant 0.000000e+00 : f32
    %87 = vector.broadcast %cst_24 : f32 to vector<1x256xf32>
    %88 = arith.select %25, %86, %87 : vector<1x256xi1>, vector<1x256xf32>
    %89 = vector.broadcast %85 : f32 to vector<1x256xf32>
    %90 = arith.mulf %89, %88 : vector<1x256xf32>
    %91 = arith.addf %84, %90 : vector<1x256xf32>
    %c16_i32_25 = arith.constant 16 : i32
    %92 = tpu.dynamic_rotate %4 by %c16_i32_25 dim 1 : vector<1x256xf32>, i32 -> vector<1x256xf32>
    %cst_26 = arith.constant 0.000000e+00 : f32
    %93 = vector.broadcast %cst_26 : f32 to vector<1x256xf32>
    %94 = arith.select %27, %92, %93 : vector<1x256xi1>, vector<1x256xf32>
    %c9 = arith.constant 9 : index
    %95 = memref.load %arg1[%c9] : memref<19xf32, #tpu.memory_space<smem>>
    %c1_i32_27 = arith.constant 1 : i32
    %96 = tpu.dynamic_rotate %94 by %c1_i32_27 dim 1 : vector<1x256xf32>, i32 -> vector<1x256xf32>
    %cst_28 = arith.constant 0.000000e+00 : f32
    %97 = vector.broadcast %cst_28 : f32 to vector<1x256xf32>
    %98 = arith.select %23, %96, %97 : vector<1x256xi1>, vector<1x256xf32>
    %99 = vector.broadcast %95 : f32 to vector<1x256xf32>
    %100 = arith.mulf %99, %98 : vector<1x256xf32>
    %101 = arith.addf %91, %100 : vector<1x256xf32>
    %c10 = arith.constant 10 : index
    %102 = memref.load %arg1[%c10] : memref<19xf32, #tpu.memory_space<smem>>
    %103 = vector.broadcast %102 : f32 to vector<1x256xf32>
    %104 = arith.mulf %103, %94 : vector<1x256xf32>
    %105 = arith.addf %101, %104 : vector<1x256xf32>
    %c11 = arith.constant 11 : index
    %106 = memref.load %arg1[%c11] : memref<19xf32, #tpu.memory_space<smem>>
    %c255_i32_29 = arith.constant 255 : i32
    %107 = tpu.dynamic_rotate %94 by %c255_i32_29 dim 1 : vector<1x256xf32>, i32 -> vector<1x256xf32>
    %cst_30 = arith.constant 0.000000e+00 : f32
    %108 = vector.broadcast %cst_30 : f32 to vector<1x256xf32>
    %109 = arith.select %25, %107, %108 : vector<1x256xi1>, vector<1x256xf32>
    %110 = vector.broadcast %106 : f32 to vector<1x256xf32>
    %111 = arith.mulf %110, %109 : vector<1x256xf32>
    %112 = arith.addf %105, %111 : vector<1x256xf32>
    %c12 = arith.constant 12 : index
    %113 = memref.load %arg1[%c12] : memref<19xf32, #tpu.memory_space<smem>>
    %c1_i32_31 = arith.constant 1 : i32
    %114 = tpu.dynamic_rotate %4 by %c1_i32_31 dim 1 : vector<1x256xf32>, i32 -> vector<1x256xf32>
    %cst_32 = arith.constant 0.000000e+00 : f32
    %115 = vector.broadcast %cst_32 : f32 to vector<1x256xf32>
    %116 = arith.select %23, %114, %115 : vector<1x256xi1>, vector<1x256xf32>
    %117 = vector.broadcast %113 : f32 to vector<1x256xf32>
    %118 = arith.mulf %117, %116 : vector<1x256xf32>
    %119 = arith.addf %112, %118 : vector<1x256xf32>
    %c13 = arith.constant 13 : index
    %120 = memref.load %arg1[%c13] : memref<19xf32, #tpu.memory_space<smem>>
    %121 = vector.broadcast %120 : f32 to vector<1x256xf32>
    %122 = arith.mulf %121, %4 : vector<1x256xf32>
    %123 = arith.addf %119, %122 : vector<1x256xf32>
    %c14 = arith.constant 14 : index
    %124 = memref.load %arg1[%c14] : memref<19xf32, #tpu.memory_space<smem>>
    %c255_i32_33 = arith.constant 255 : i32
    %125 = tpu.dynamic_rotate %4 by %c255_i32_33 dim 1 : vector<1x256xf32>, i32 -> vector<1x256xf32>
    %cst_34 = arith.constant 0.000000e+00 : f32
    %126 = vector.broadcast %cst_34 : f32 to vector<1x256xf32>
    %127 = arith.select %25, %125, %126 : vector<1x256xi1>, vector<1x256xf32>
    %128 = vector.broadcast %124 : f32 to vector<1x256xf32>
    %129 = arith.mulf %128, %127 : vector<1x256xf32>
    %130 = arith.addf %123, %129 : vector<1x256xf32>
    %c240_i32_35 = arith.constant 240 : i32
    %131 = tpu.dynamic_rotate %4 by %c240_i32_35 dim 1 : vector<1x256xf32>, i32 -> vector<1x256xf32>
    %cst_36 = arith.constant 0.000000e+00 : f32
    %132 = vector.broadcast %cst_36 : f32 to vector<1x256xf32>
    %133 = arith.select %29, %131, %132 : vector<1x256xi1>, vector<1x256xf32>
    %c15 = arith.constant 15 : index
    %134 = memref.load %arg1[%c15] : memref<19xf32, #tpu.memory_space<smem>>
    %c1_i32_37 = arith.constant 1 : i32
    %135 = tpu.dynamic_rotate %133 by %c1_i32_37 dim 1 : vector<1x256xf32>, i32 -> vector<1x256xf32>
    %cst_38 = arith.constant 0.000000e+00 : f32
    %136 = vector.broadcast %cst_38 : f32 to vector<1x256xf32>
    %137 = arith.select %23, %135, %136 : vector<1x256xi1>, vector<1x256xf32>
    %138 = vector.broadcast %134 : f32 to vector<1x256xf32>
    %139 = arith.mulf %138, %137 : vector<1x256xf32>
    %140 = arith.addf %130, %139 : vector<1x256xf32>
    %c16 = arith.constant 16 : index
    %141 = memref.load %arg1[%c16] : memref<19xf32, #tpu.memory_space<smem>>
    %142 = vector.broadcast %141 : f32 to vector<1x256xf32>
    %143 = arith.mulf %142, %133 : vector<1x256xf32>
    %144 = arith.addf %140, %143 : vector<1x256xf32>
    %c17 = arith.constant 17 : index
    %145 = memref.load %arg1[%c17] : memref<19xf32, #tpu.memory_space<smem>>
    %c255_i32_39 = arith.constant 255 : i32
    %146 = tpu.dynamic_rotate %133 by %c255_i32_39 dim 1 : vector<1x256xf32>, i32 -> vector<1x256xf32>
    %cst_40 = arith.constant 0.000000e+00 : f32
    %147 = vector.broadcast %cst_40 : f32 to vector<1x256xf32>
    %148 = arith.select %25, %146, %147 : vector<1x256xi1>, vector<1x256xf32>
    %149 = vector.broadcast %145 : f32 to vector<1x256xf32>
    %150 = arith.mulf %149, %148 : vector<1x256xf32>
    %151 = arith.addf %144, %150 : vector<1x256xf32>
    %cst_41 = arith.constant 0.000000e+00 : f32
    %152 = vector.broadcast %cst_41 : f32 to vector<1x256xf32>
    %153 = arith.maximumf %151, %152 : vector<1x256xf32>
    %154 = arith.negf %153 : vector<1x256xf32>
    %155 = math.exp %154 : vector<1x256xf32>
    %cst_42 = arith.constant 1.000000e+00 : f32
    %156 = vector.broadcast %cst_42 : f32 to vector<1x256xf32>
    %157 = arith.addf %156, %155 : vector<1x256xf32>
    %158 = arith.divf %156, %157 : vector<1x256xf32>
    %159 = vector.shape_cast %158 : vector<1x256xf32> to vector<1x1x256xf32>
    %160 = vector.broadcast %159 : vector<1x1x256xf32> to vector<1x4x256xf32>
    %161 = arith.mulf %0, %160 : vector<1x4x256xf32>
    %c0_43 = arith.constant 0 : index
    %c0_44 = arith.constant 0 : index
    %c0_45 = arith.constant 0 : index
    %162 = vector.load %arg3[%c0_43, %c0_44, %c0_45] : memref<1x4x256xf32, #tpu.memory_space<vmem>>, vector<1x4x256xf32>
    tpu.vector_store %arg3[%c0_43, %c0_44, %c0_45], %161 {strides = array<i32>} : memref<1x4x256xf32, #tpu.memory_space<vmem>>, vector<1x4x256xf32>,
    return
  }
  func.func @transform_0(%arg0: i32) -> i32 {
    %c0_i32 = arith.constant 0 : i32
    %c0_i32_0 = arith.constant 0 : i32
    return %c0_i32 : i32
  }
  func.func @transform_1(%arg0: i32) -> (i32, i32, i32) {
    %c0_i32 = arith.constant 0 : i32
    %c0_i32_0 = arith.constant 0 : i32
    %c0_i32_1 = arith.constant 0 : i32
    return %arg0, %c0_i32, %c0_i32_0 : i32, i32, i32
  }
  func.func @transform_2(%arg0: i32) -> (i32, i32, i32) {
    %c0_i32 = arith.constant 0 : i32
    %c0_i32_0 = arith.constant 0 : i32
    %c0_i32_1 = arith.constant 0 : i32
    return %arg0, %c0_i32, %c0_i32_0 : i32, i32, i32
  }
}

</mosaic_0001>

<bundles_post_ra>
// kernel: tpu_custom_call.1
= control target key start
LH: loop header
LB: loop body
LE: loop exit
PB: predicated region body
PF: predicated region fallthrough
CT: control target
= control target key end

     0   :  { %7 = vsyncpa [#allocation5], 0  ;;  %s1372_s0 = inlined_call_operand.hbm [shape: f32[19], index: 0, kind: input, shape index: {}]   ;;  %s1373_s1 = inlined_call_operand.hbm [shape: f32[2,4,256], index: 1, kind: input, shape index: {}]   ;;  %s1374_s2 = inlined_call_operand.hbm [shape: f32[2,4,256], index: 2, kind: output, shape index: {}]  }
   0x1   :  { %8 = vsyncpa [#allocation3], 0 }
   0x2   :  { %10 = vsyncpa [#allocation3 + $0x1], 0 }
   0x3   :  { %11 = vsyncpa [#allocation4], 0 }
   0x4   :  { %13 = vsyncpa [#allocation4 + $0x1], 0  ;;  %s854_s9 = smov 0   ;;  %s856_s10 = smov 0  }
   0x5   :  { %s858_s11 = smov 0   ;;  %s860_s12 = smov 0  }
   0x6 LB: > { %s875_s13 = sadd.s32 4294967295, %s830_s12   ;;  %s609_s14 = sadd.s32 4294967294, %s830_s12   ;;  %s830_s12 = sphi %s860_s12, %s1403_s12   ;;  %s826_s11 = sphi %s858_s11, %s1402_s11   ;;  %s822_s10 = sphi %s856_s10, %s1401_s10   ;;  %s818_s9 = sphi %s854_s9, %s1400_s9  }
   0x7   : > { %p60_p0 = scmp.ne.s32.totalorder %s822_s10, %s818_s9  ;;  %p1375_p1 = scmp.eq.s32.totalorder %s875_s13, 0 }
   0x8   : > { %p90_p3 = scmp.eq.s32.totalorder %s609_s14, 1  ;;  %p610_p5 = scmp.ge.s32.totalorder %s830_s12, 1 }
   0x9   : > { %p884_p4 = por %p1375_p1, %p60_p0  ;;  %p97_p7 = scmp.lt.s32.totalorder %s830_s12, 3 }
   0xa   : > { %p889_p6 = por %p90_p3, %p60_p0  ;;  %s900_s18 = sadd.s32 1, %s830_s12  }
   0xb   : > { %s1378_s15 = scalar_select %p884_p4, 1, 0 }
   0xc   : > { %s1379_s16 = scalar_select %p889_p6, 1, 0 }
   0xd   : > { %p894_p8 = pnand %p610_p5, %p97_p7  ;;  %s44_s19 = ssub.s32 %s830_s12, %s900_s18 }
   0xe   : > { %s47_s20 = sadd.s32 1, %s826_s11  ;;  %p913_p12 = scmp.eq.s32.totalorder %s44_s19, 0 }
   0xf   : > { %p655_p10 = pneg %p894_p8  ;;  %p54_p13 = scmp.ne.s32.totalorder %s826_s11, %s822_s10 }
  0x10   : > { %p55_p0 = scmp.eq.s32.totalorder %s830_s12, 0  ;;  %p668_p3 = scmp.lt.s32.totalorder %s830_s12, 2 }
  0x11   : > { %p909_p11 = pnand %p655_p10, %p1375_p1  ;;  %s717_s25 = scalar_lea.hbm %s1372_s0, 16 }
  0x12   : > { %p718_p5 = scmp.ne.s32.totalorder %s1372_s0, %s717_s25  ;;  %p724_p1 = scmp.lt.u32.totalorder %s717_s25, %s1372_s0 }
  0x13   : > { %p719_p7 = pneg %p909_p11 }
  0x15   : > { %p720_p10 = pnand %p719_p7, %p718_p5 }
  0x17   : > { %p721_p9 = pneg %p720_p10 }
  0x19   : > { %p726_p2 = pnand %p724_p1, %p721_p9 }
  0x1b   : > { %729 = shalt.err (!%p726_p2)
}
  0x1c   : > { %s832_s30 = smov [#allocation2]   ;;  %p56_p1 = por %p55_p0, %p54_p13 }
  0x1d   : > { %658 = dma.hbm_to_smem (!%p909_p11), %s1372_s0, 16, %s832_s30, [#allocation5]  }
  0x1e   : > { %s940_s5 = scalar_select %p913_p12, %s826_s11, %s47_s20  }
  0x1f   : > { %p1383_p2 = scmp.eq.s32.totalorder %s875_s13, 1  ;;  %s119_s7 = sand.u32 1, %s826_s11  }
  0x20   : > { %s645_s8 = sshll.u32 %s830_s12, 7  ;;  %s613_s14 = sshll.u32 %s119_s7, 3 }
  0x21   : > { %p952_p9 = por %p1383_p2, %p54_p13  ;;  %s961_s23 = scalar_lea.hbm %s1373_s1, %s645_s8 }
  0x22   : > { %s123_s20 = scalar_lea.vmem [#allocation6], %s613_s14  ;;  %p965_p11 = pnand %p668_p3, %p56_p1 }
  0x23   : > { %s1384_s6 = scalar_select %p952_p9, 1, 0 }
  0x24   : > { %s131_s22 = sshll.u32 %s123_s20, 4  ;;  %s120_s25 = scalar_lea.sflag [#allocation3], %s119_s7  ;;  %s969_s22 = int_to_ptr.vmem [resolvable:$true] %s131_s22 }
  0x25   : > { %s730_s26 = scalar_lea.hbm %s961_s23, 128  ;;  %p732_p13 = pneg %p965_p11 }
  0x26   : > { %p731_p12 = scmp.ne.s32.totalorder %s961_s23, %s730_s26  ;;  %s735_s29 = scalar_lea.hbm %s1373_s1, 256 }
  0x27   : > { %p736_p3 = scmp.lt.u32.totalorder %s961_s23, %s1373_s1  ;;  %p737_p7 = scmp.lt.u32.totalorder %s735_s29, %s730_s26 }
  0x28   : > { %p733_p0 = pnand %p732_p13, %p731_p12  ;;  %p739_p1 = scmp.lt.u32.totalorder %s730_s26, %s961_s23 }
  0x29   : > { %p738_p10 = por %p737_p7, %p736_p3 }
  0x2a   : > { %p734_p5 = pneg %p733_p0 }
  0x2b   : > { %p740_p2 = por %p739_p1, %p738_p10 }
  0x2d   : > { %p741_p6 = pnand %p740_p2, %p734_p5 }
  0x2f   : > { %744 = shalt.err (!%p741_p6)
}
  0x30   : > { %s745_s4 = scalar_lea.vmem %s969_s22, 128  ;;  %s833_s7 = smov [#allocation6]  }
  0x31   : > { %p746_p12 = scmp.ne.s32.totalorder %s969_s22, %s745_s4  ;;  %s750_s8 = sshll.u32 %s833_s7, 4  ;;  %s751_s8 = int_to_ptr.vmem [resolvable:$false] %s750_s8 }
  0x32   : > { %s752_s14 = scalar_lea.vmem %s751_s8, 256  ;;  %p753_p4 = scmp.lt.s32.totalorder %s969_s22, %s751_s8 }
  0x33   : > { %p748_p0 = pnand %p746_p12, %p732_p13  ;;  %p754_p3 = scmp.lt.s32.totalorder %s752_s14, %s745_s4 }
  0x35   : > { %p749_p9 = pneg %p748_p0  ;;  %p755_p7 = por %p754_p3, %p753_p4 }
  0x37   : > { %p756_p10 = pnand %p755_p7, %p749_p9 }
  0x39   : > { %759 = shalt.err (!%p756_p10)
}
  0x3a   : > { %662 = dma.hbm_to_vmem [thread:$0]  (!%p965_p11), %s961_s23, 128, %s969_s22, %s120_s25  }
  0x3b   : > { %140 = sbr.rel (%p894_p8) target bundleno = 414 (0x19e), region = 28  ;;  %p1386_p6 = scmp.eq.s32.totalorder (!%p894_p8), %s875_s13, 0 }
  0x42   : > { %805 = dma.done.wait (%p1386_p6), [#allocation5], 16   ;;  %p1387_p13 = pmov %p1386_p6 }
  0x43   : > { %s1003_s19 = sand.u32 1, %s822_s10   ;;  %p1388_p4 = scmp.ne.s32.totalorder %s1378_s15, 0 }
  0x44   : > { %807 = vsyncadd (%p1387_p13), [#allocation5], 4294967280  ;;  %s618_s21 = sshll.u32 %s1003_s19, 3  ;;  %s147_s20 = scalar_lea.sflag [#allocation3], %s1003_s19 }
  0x45   : > { %s150_s23 = scalar_lea.vmem [#allocation6], %s618_s21 }
  0x46   : > { %809 = dma.done.wait (%p1388_p4), %s147_s20, 128  }
  0x47   : > { %811 = vsyncadd (%p1388_p4), %s147_s20, 4294967168 }
  0x48   : > { %155 = sfence }
  0x49   : > { %v1013_v0 = vld [vmem:[%s150_s23] sm:$0xff]  ;;  %vm176_vm0 = vcmask 1043456   ;;  %s834_s15 = smov 16   ;;  %s835_s17 = smov 112   ;;  %v207_v32 = vlaneseq }
  0x4a   : > { %v177_v1 = vsel %vm176_vm0, %v1013_v0, -inf  ;;  %v174_v2 = vcombine.high %v1013_v0, %v1013_v0  ;;  %v191_v3 = vsel %vm176_vm0, %v1013_v0, 0.0  ;;  %s836_s22 = smov 1   ;;  %s837_s24 = smov 127  }
  0x4b   : > { %v178_v4 = vrot.slane %v177_v1, 4  ;;  %v192_v5 = vrot.slane %v191_v3, 4  ;;  %v1044_v33 = vand.u32 127, %v207_v32  ;;  %s621_s25 = sld [smem:[#allocation2 + $0x1]]  ;;  %s253_s26 = sld [smem:[#allocation2]]  ;;  %v499_v55 = vshrl.u32 %v207_v32, 7 }
  0x4c   : > { %v184_v6 = vsel %vm176_vm0, %v174_v2, -inf  ;;  %v198_v7 = vsel %vm176_vm0, %v174_v2, 0.0  ;;  %s1152_s27 = sld [smem:[#allocation2 + $0x12]]  ;;  %s1154_s28 = sld [smem:[#allocation2 + $0x3]] }
  0x4d   : > { %v179_v8 = vmax.f32 %v177_v1, %v178_v4  ;;  %v185_v9 = vrot.slane %v184_v6, 4  ;;  %v199_v10 = vrot.slane %v198_v7, 4  ;;  %v193_v11 = vadd.f32 %v192_v5, %v191_v3  ;;  %s1156_s29 = sld [smem:[#allocation2 + $0x2]]  ;;  %s1158_s30 = sld [smem:[#allocation2 + $0x4]] }
  0x4e   : > { %vm248_vm1 = vcmp.lt.s32.totalorder %v1044_v33, 16  ;;  %vm238_vm2 = vcmp.ge.s32.totalorder %v1044_v33, 16  ;;  %v209_v43 = vadd.s32 128, %v1044_v33  ;;  %vm327_vm3 = vcmp.lt.s32.totalorder %v1044_v33, 112  ;;  %s1161_s3 = sld [smem:[#allocation2 + $0x5]]  ;;  %s1182_s4 = sld [smem:[#allocation2 + $0x7]] }
  0x4f   : > { %v180_v12 = vrot.slane %v179_v8, 2  ;;  %v186_v13 = vmax.f32 %v184_v6, %v185_v9  ;;  %v200_v14 = vadd.f32 %v199_v10, %v198_v7  ;;  %v194_v15 = vrot.slane %v193_v11, 2  ;;  %s1186_s7 = sld [smem:[#allocation2 + $0x6]]  ;;  %s1203_s8 = sld [smem:[#allocation2 + $0x8]] }
  0x50   : > { %v221_v44 = vand.u32 15, %v209_v43  ;;  %vm241_vm4 = vcmp.lt.s32.totalorder %v209_v43, 240  ;;  %vm258_vm5 = vcmp.lt.s32.totalorder %v1044_v33, 1  ;;  %vm279_vm7 = vcmp.lt.s32.totalorder %v1044_v33, 127  ;;  %s1216_s14 = sld [smem:[#allocation2 + $0xa]]  ;;  %s1226_s20 = sld [smem:[#allocation2 + $0x9]] }
  0x51   : > { %v181_v16 = vmax.f32 %v179_v8, %v180_v12  ;;  %v187_v17 = vrot.slane %v186_v13, 2  ;;  %v201_v18 = vrot.slane %v200_v14, 2  ;;  %v195_v19 = vadd.f32 %v194_v15, %v193_v11  ;;  %s1233_s23 = sld [smem:[#allocation2 + $0xc]]  ;;  %p1397_p9 = scmp.ne.s32.totalorder %s1384_s6, 0 }
  0x52   : > { %vm1079_vm6 = vcmp.ge.s32.totalorder %v221_v44, 1  ;;  %vm1096_vm8 = vcmp.lt.s32.totalorder %v221_v44, 15  ;;  %v214_v3 = vand.u32 15, %v1044_v33  ;;  %v269_v5 = vstv %s621_s25  ;;  %s1276_s25 = sld [smem:[#allocation2 + $0xf]] }
  0x53   : > { %v182_v20 = vrot.slane %v181_v16, 1  ;;  %v188_v21 = vmax.f32 %v186_v13, %v187_v17  ;;  %v202_v22 = vadd.f32 %v201_v18, %v200_v14  ;;  %v196_v23 = vrot.slane %v195_v19, 1 }
  0x54   : > { %v263_v6 = vstv %s253_s26  ;;  %vm1163_vm9 = vcmp.ge.s32.totalorder %v214_v3, 1  ;;  %vm1173_vm10 = vcmp.lt.s32.totalorder %v214_v3, 15  ;;  %v243_v13 = vstv %s1152_s27  ;;  %s1289_s26 = sld [smem:[#allocation2 + $0x11]]  ;;  %s646_s27 = sshll.u32 %s875_s13, 7 }
  0x55   : > { %v1019_v24 = vmax.f32 %v181_v16, %v182_v20  ;;  %v189_v25 = vrot.slane %v188_v21, 1  ;;  %v203_v26 = vrot.slane %v202_v22, 1  ;;  %v197_v29 = vadd.f32 %v196_v23, %v195_v19  ;;  %s838_s13 = smov [#allocation7]  }
  0x56   : > { %v298_v16 = vstv %s1154_s28  ;;  %v284_v20 = vstv %s1156_s29  ;;  %s171_s28 = scalar_lea.vmem [#allocation7], %s618_s21  ;;  %s764_s21 = sshll.u32 %s838_s13, 4  ;;  %s765_s21 = int_to_ptr.vmem [resolvable:$false] %s764_s21 }
  0x57   : > { %244 = vrot.lane.b32.xlu0 %v1019_v24, %s834_s15  ;;  %v1022_v27 = vmax.f32 %v188_v21, %v189_v25  ;;  %323 = vrot.lane.b32.xlu1 %v1019_v24, %s835_s17  ;;  %v204_v28 = vadd.f32 %v203_v26, %v202_v22  ;;  %v1029_v31 = vmul.f32 0.25, %v197_v29  ;;  %v304_v26 = vstv %s1158_s30  ;;  %s527_s29 = sshll.u32 %s171_s28, 4  ;;  %s1330_s29 = int_to_ptr.vmem [resolvable:$true] %s527_s29 }
  0x58   : > { %p767_p1 = scmp.lt.s32.totalorder %s1330_s29, %s765_s21 }
  0x59   : > { %v1027_v30 = vmul.f32 0.25, %v204_v28 }
  0x5b   : > { %246 = vrot.lane.b32.xlu0 %v1022_v27, %s834_s15  ;;  %325 = vrot.lane.b32.xlu1 %v1022_v27, %s835_s17 }
  0x5f   : > { %368 = vrot.lane.b32.xlu1 %v1027_v30, %s834_s15  ;;  %366 = vrot.lane.b32.xlu0 %v1029_v31, %s834_s15  ;;  %s1241_s15 = sld [smem:[#allocation2 + $0xb]] }
  0x63   : > { %444 = vrot.lane.b32.xlu1 %v1027_v30, %s835_s17  ;;  %442 = vrot.lane.b32.xlu0 %v1029_v31, %s835_s17  ;;  %s1243_s17 = sld [smem:[#allocation2 + $0xd]] }
  0x67   : > { %292 = vrot.lane.b32.xlu1 %v1022_v27, %s836_s22  ;;  %290 = vrot.lane.b32.xlu0 %v1019_v24, %s836_s22 }
  0x6b   : > { %312 = vrot.lane.b32.xlu1 %v1022_v27, %s837_s24  ;;  %310 = vrot.lane.b32.xlu0 %v1019_v24, %s837_s24 }
  0xc9   : > { %v245_v34 = vpop.permute.xlu0 %244  ;;  %v324_v35 = vpop.permute.xlu1 %323 }
  0xcd   : > { %v247_v36 = vpop.permute.xlu0 %246  ;;  %v326_v37 = vpop.permute.xlu1 %325 }
  0xce   : > { %v250_v38 = vsel %vm248_vm1, %v247_v36, %v245_v34  ;;  %v1052_v39 = vsel %vm248_vm1, %v245_v34, %v247_v36  ;;  %v329_v47 = vsel %vm327_vm3, %v326_v37, %v324_v35  ;;  %v1074_v48 = vsel %vm327_vm3, %v324_v35, %v326_v37 }
  0xcf   : > { %256 = vrot.lane.b32.xlu1 %v1052_v39, %s836_s22  ;;  %v1058_v40 = vsel %vm238_vm2, %v250_v38, 0.0  ;;  %v1084_v52 = vsel %vm241_vm4, %v329_v47, 0.0  ;;  %v271_v21 = vmul.f32 %v269_v5, %v1052_v39  ;;  %v305_v47 = vmul.f32 %v304_v26, %v1019_v24 }
  0xd0   : > { %254 = vrot.lane.b32.xlu0 %v1058_v40, %s836_s22  ;;  %v270_v22 = vmul.f32 %v269_v5, %v1058_v40  ;;  %v341_v5 = vstv %s1186_s7  ;;  %s513_s7 = scalar_lea.sflag [#allocation4], %s1003_s19 }
  0xd1   : > { %v369_v41 = vpop.permute.xlu1 %368  ;;  %v367_v42 = vpop.permute.xlu0 %366 }
  0xd2   : > { %v371_v58 = vsel %vm248_vm1, %v369_v41, %v367_v42  ;;  %v1117_v61 = vsel %vm248_vm1, %v367_v42, %v369_v41 }
  0xd3   : > { %277 = vrot.lane.b32.xlu1 %v1052_v39, %s837_s24  ;;  %v1121_v62 = vsel %vm238_vm2, %v371_v58, 0.0 }
  0xd4   : > { %275 = vrot.lane.b32.xlu0 %v1058_v40, %s837_s24 }
  0xd5   : > { %v445_v45 = vpop.permute.xlu1 %444  ;;  %v443_v46 = vpop.permute.xlu0 %442 }
  0xd6   : > { %v447_v63 = vsel %vm327_vm3, %v445_v45, %v443_v46  ;;  %v1142_v2 = vsel %vm327_vm3, %v443_v46, %v445_v45  ;;  %v318_v45 = vstv %s1161_s3 }
  0xd7   : > { %411 = vrot.lane.b32.xlu1 %v1027_v30, %s836_s22  ;;  %v1138_v1 = vsel %vm241_vm4, %v447_v63, 0.0  ;;  %v347_v63 = vstv %s1182_s4  ;;  %s1328_s4 = scalar_lea.hbm %s1374_s2, %s646_s27 }
  0xd8   : > { %333 = vrot.lane.b32.xlu0 %v1074_v48, %s836_s22 }
  0xd9   : > { %v293_v50 = vpop.permute.xlu1 %292  ;;  %v291_v51 = vpop.permute.xlu0 %290 }
  0xda   : > { %v1088_v53 = vsel %vm258_vm5, %v291_v51, %v293_v50  ;;  %v295_v9 = vsel %vm258_vm5, %v293_v50, %v291_v51  ;;  %v306_v50 = vmul.f32 %v304_v26, %v1022_v27 }
  0xdb   : > { %335 = vrot.lane.b32.xlu1 %v1084_v52, %s836_s22  ;;  %v297_v54 = vsel %vm1079_vm6, %v1088_v53, 0.0  ;;  %v296_v23 = vsel %vm1163_vm9, %v295_v9, 0.0 }
  0xdc   : > { %353 = vrot.lane.b32.xlu0 %v1074_v48, %s837_s24  ;;  %v299_v44 = vmul.f32 %v298_v16, %v296_v23  ;;  %v300_v51 = vmul.f32 %v298_v16, %v297_v54  ;;  %v361_v16 = vstv %s1203_s8  ;;  %s760_s8 = scalar_lea.vmem %s1330_s29, 128 }
  0xdd   : > { %v313_v56 = vpop.permute.xlu1 %312  ;;  %v311_v57 = vpop.permute.xlu0 %310  ;;  %p761_p8 = scmp.ne.s32.totalorder %s1330_s29, %s760_s8 }
  0xde   : > { %v1106_v59 = vsel %vm279_vm7, %v313_v56, %v311_v57  ;;  %v314_v36 = vsel %vm279_vm7, %v311_v57, %v313_v56 }
  0xdf   : > { %355 = vrot.lane.b32.xlu1 %v1084_v52, %s837_s24  ;;  %v317_v60 = vsel %vm1096_vm8, %v1106_v59, 0.0  ;;  %v316_v56 = vsel %vm1173_vm10, %v314_v36, 0.0  ;;  %p762_p11 = pnand %p761_p8, %p1397_p9 }
  0xe0   : > { %409 = vrot.lane.b32.xlu0 %v1029_v31, %s836_s22  ;;  %v319_v24 = vmul.f32 %v318_v45, %v316_v56  ;;  %v320_v27 = vmul.f32 %v318_v45, %v317_v60 }
  0xe1   : > { %p763_p5 = pneg %p762_p11 }
  0xe3   : > { %377 = vrot.lane.b32.xlu1 %v1117_v61, %s836_s22 }
  0xe4   : > { %375 = vrot.lane.b32.xlu0 %v1121_v62, %s836_s22 }
  0xe7   : > { %397 = vrot.lane.b32.xlu1 %v1117_v61, %s837_s24 }
  0xe8   : > { %395 = vrot.lane.b32.xlu0 %v1121_v62, %s837_s24 }
  0xeb   : > { %431 = vrot.lane.b32.xlu1 %v1027_v30, %s837_s24 }
  0xec   : > { %429 = vrot.lane.b32.xlu0 %v1029_v31, %s837_s24 }
  0xef   : > { %453 = vrot.lane.b32.xlu1 %v1138_v1, %s836_s22 }
  0xf0   : > { %451 = vrot.lane.b32.xlu0 %v1142_v2, %s836_s22  ;;  %s1251_s22 = sld [smem:[#allocation2 + $0xe]] }
  0xf3   : > { %473 = vrot.lane.b32.xlu1 %v1138_v1, %s837_s24 }
  0xf4   : > { %471 = vrot.lane.b32.xlu0 %v1142_v2, %s837_s24  ;;  %s1269_s24 = sld [smem:[#allocation2 + $0x10]] }
 0x141   : > { %v257_v4 = vpop.permute.xlu1 %256 }
 0x142   : > { %v255_v7 = vpop.permute.xlu0 %254 }
 0x143   : > { %v259_v10 = vsel %vm258_vm5, %v255_v7, %v257_v4  ;;  %v260_v11 = vsel %vm258_vm5, %v257_v4, %v255_v7 }
 0x144   : > { %v261_v14 = vsel %vm1163_vm9, %v260_v11, 0.0  ;;  %v262_v15 = vsel %vm1079_vm6, %v259_v10, 0.0 }
 0x145   : > { %v264_v17 = vmul.f32 %v263_v6, %v261_v14  ;;  %v265_v18 = vmul.f32 %v263_v6, %v262_v15  ;;  %v278_v19 = vpop.permute.xlu1 %277 }
 0x146   : > { %v276_v25 = vpop.permute.xlu0 %275 }
 0x147   : > { %v266_v28 = vadd.f32 %v264_v17, %v243_v13  ;;  %v267_v29 = vadd.f32 %v265_v18, %v243_v13  ;;  %v280_v34 = vsel %vm279_vm7, %v276_v25, %v278_v19  ;;  %v281_v35 = vsel %vm279_vm7, %v278_v19, %v276_v25 }
 0x148   : > { %v282_v37 = vsel %vm1173_vm10, %v280_v34, 0.0  ;;  %v283_v38 = vsel %vm1096_vm8, %v281_v35, 0.0  ;;  %v348_v18 = vmul.f32 %v347_v63, %v1074_v48  ;;  %v349_v19 = vmul.f32 %v347_v63, %v1084_v52 }
 0x149   : > { %v272_v39 = vadd.f32 %v270_v22, %v266_v28  ;;  %v273_v40 = vadd.f32 %v271_v21, %v267_v29  ;;  %v285_v41 = vmul.f32 %v284_v20, %v282_v37  ;;  %v286_v42 = vmul.f32 %v284_v20, %v283_v38  ;;  %v412_v43 = vpop.permute.xlu1 %411 }
 0x14a   : > { %v334_v46 = vpop.permute.xlu0 %333  ;;  %v389_v38 = vstv %s1216_s14  ;;  %v417_v63 = vstv %s1233_s23  ;;  %s766_s14 = scalar_lea.vmem %s765_s21, 256 }
 0x14b   : > { %v287_v57 = vadd.f32 %v285_v41, %v272_v39  ;;  %v288_v58 = vadd.f32 %v286_v42, %v273_v40  ;;  %v383_v40 = vstv %s1226_s20  ;;  %p768_p2 = scmp.lt.s32.totalorder %s766_s14, %s760_s8 }
 0x14d   : > { %v301_v3 = vadd.f32 %v299_v44, %v287_v57  ;;  %v302_v4 = vadd.f32 %v300_v51, %v288_v58  ;;  %v336_v6 = vpop.permute.xlu1 %335  ;;  %v390_v51 = vmul.f32 %v389_v38, %v1121_v62  ;;  %p769_p12 = por %p768_p2, %p767_p1 }
 0x14e   : > { %v337_v53 = vsel %vm258_vm5, %v334_v46, %v336_v6  ;;  %v338_v54 = vsel %vm258_vm5, %v336_v6, %v334_v46  ;;  %v354_v7 = vpop.permute.xlu0 %353  ;;  %v423_v6 = vstv %s1243_s17 }
 0x14f   : > { %v307_v9 = vadd.f32 %v305_v47, %v301_v3  ;;  %v308_v10 = vadd.f32 %v306_v50, %v302_v4  ;;  %v339_v11 = vsel %vm1163_vm9, %v338_v54, 0.0  ;;  %v340_v13 = vsel %vm1079_vm6, %v337_v53, 0.0  ;;  %p770_p0 = pnand %p769_p12, %p763_p5 }
 0x150   : > { %v342_v14 = vmul.f32 %v341_v5, %v339_v11  ;;  %v343_v59 = vmul.f32 %v341_v5, %v340_v13  ;;  %v403_v4 = vstv %s1241_s15 }
 0x151   : > { %v321_v60 = vadd.f32 %v319_v24, %v307_v9  ;;  %v322_v15 = vadd.f32 %v320_v27, %v308_v10  ;;  %v356_v17 = vpop.permute.xlu1 %355 }
 0x152   : > { %v357_v20 = vsel %vm279_vm7, %v354_v7, %v356_v17  ;;  %v358_v21 = vsel %vm279_vm7, %v356_v17, %v354_v7  ;;  %v410_v22 = vpop.permute.xlu0 %409  ;;  %v437_v7 = vstv %s1251_s22 }
 0x153   : > { %v344_v23 = vadd.f32 %v342_v14, %v321_v60  ;;  %v345_v25 = vadd.f32 %v343_v59, %v322_v15  ;;  %v359_v48 = vsel %vm1173_vm10, %v357_v20, 0.0  ;;  %v360_v52 = vsel %vm1096_vm8, %v358_v21, 0.0 }
 0x154   : > { %v362_v26 = vmul.f32 %v361_v16, %v359_v48  ;;  %v363_v28 = vmul.f32 %v361_v16, %v360_v52  ;;  %v413_v29 = vsel %vm258_vm5, %v410_v22, %v412_v43  ;;  %v414_v39 = vsel %vm258_vm5, %v412_v43, %v410_v22 }
 0x155   : > { %v350_v34 = vadd.f32 %v348_v18, %v344_v23  ;;  %v351_v35 = vadd.f32 %v349_v19, %v345_v25  ;;  %v416_v36 = vsel %vm1079_vm6, %v413_v29, 0.0  ;;  %v378_v37 = vpop.permute.xlu1 %377  ;;  %v391_v43 = vmul.f32 %v389_v38, %v1117_v61 }
 0x156   : > { %v376_v41 = vpop.permute.xlu0 %375  ;;  %v415_v3 = vsel %vm1163_vm9, %v414_v39, 0.0  ;;  %v419_v60 = vmul.f32 %v417_v63, %v416_v36  ;;  %v424_v15 = vmul.f32 %v423_v6, %v1029_v31  ;;  %v425_v16 = vmul.f32 %v423_v6, %v1027_v30 }
 0x157   : > { %v364_v42 = vadd.f32 %v362_v26, %v350_v34  ;;  %v365_v44 = vadd.f32 %v363_v28, %v351_v35  ;;  %v379_v45 = vsel %vm258_vm5, %v376_v41, %v378_v37  ;;  %v380_v46 = vsel %vm258_vm5, %v378_v37, %v376_v41 }
 0x158   : > { %v381_v47 = vsel %vm1163_vm9, %v380_v46, 0.0  ;;  %v382_v50 = vsel %vm1079_vm6, %v379_v45, 0.0  ;;  %v418_v59 = vmul.f32 %v417_v63, %v415_v3  ;;  %v465_v48 = vstv %s1269_s24 }
 0x159   : > { %v384_v56 = vmul.f32 %v383_v40, %v381_v47  ;;  %v385_v57 = vmul.f32 %v383_v40, %v382_v50  ;;  %v398_v58 = vpop.permute.xlu1 %397  ;;  %v459_v28 = vstv %s1276_s25  ;;  %v467_v46 = vmul.f32 %v465_v48, %v1138_v1 }
 0x15a   : > { %v396_v5 = vpop.permute.xlu0 %395  ;;  %v466_v47 = vmul.f32 %v465_v48, %v1142_v2  ;;  %v479_v50 = vstv %s1289_s26 }
 0x15b   : > { %v386_v24 = vadd.f32 %v384_v56, %v364_v42  ;;  %v387_v27 = vadd.f32 %v385_v57, %v365_v44  ;;  %v399_v61 = vsel %vm279_vm7, %v396_v5, %v398_v58  ;;  %v400_v62 = vsel %vm279_vm7, %v398_v58, %v396_v5 }
 0x15c   : > { %v401_v53 = vsel %vm1173_vm10, %v399_v61, 0.0  ;;  %v402_v54 = vsel %vm1096_vm8, %v400_v62, 0.0 }
 0x15d   : > { %v392_v9 = vadd.f32 %v390_v51, %v386_v24  ;;  %v393_v10 = vadd.f32 %v391_v43, %v387_v27  ;;  %v404_v11 = vmul.f32 %v403_v4, %v401_v53  ;;  %v405_v13 = vmul.f32 %v403_v4, %v402_v54  ;;  %v432_v14 = vpop.permute.xlu1 %431 }
 0x15e   : > { %v430_v17 = vpop.permute.xlu0 %429  ;;  %v500_v54 = vsub.s32 0, %v499_v55 }
 0x15f   : > { %v406_v18 = vadd.f32 %v404_v11, %v392_v9  ;;  %v407_v19 = vadd.f32 %v405_v13, %v393_v10  ;;  %v433_v20 = vsel %vm279_vm7, %v430_v17, %v432_v14  ;;  %v434_v21 = vsel %vm279_vm7, %v432_v14, %v430_v17 }
 0x160   : > { %v435_v22 = vsel %vm1173_vm10, %v433_v20, 0.0  ;;  %v436_v31 = vsel %vm1096_vm8, %v434_v21, 0.0 }
 0x161   : > { %v420_v23 = vadd.f32 %v418_v59, %v406_v18  ;;  %v421_v25 = vadd.f32 %v419_v60, %v407_v19  ;;  %v454_v30 = vpop.permute.xlu1 %453  ;;  %v438_v52 = vmul.f32 %v437_v7, %v435_v22  ;;  %v439_v26 = vmul.f32 %v437_v7, %v436_v31 }
 0x162   : > { %v452_v29 = vpop.permute.xlu0 %451 }
 0x163   : > { %v426_v34 = vadd.f32 %v424_v15, %v420_v23  ;;  %v427_v35 = vadd.f32 %v425_v16, %v421_v25  ;;  %v455_v36 = vsel %vm258_vm5, %v452_v29, %v454_v30  ;;  %v456_v37 = vsel %vm258_vm5, %v454_v30, %v452_v29 }
 0x164   : > { %v457_v38 = vsel %vm1163_vm9, %v456_v37, 0.0  ;;  %v458_v39 = vsel %vm1079_vm6, %v455_v36, 0.0 }
 0x165   : > { %v440_v40 = vadd.f32 %v438_v52, %v426_v34  ;;  %v441_v41 = vadd.f32 %v439_v26, %v427_v35  ;;  %v460_v42 = vmul.f32 %v459_v28, %v457_v38  ;;  %v461_v44 = vmul.f32 %v459_v28, %v458_v39  ;;  %v474_v45 = vpop.permute.xlu1 %473 }
 0x166   : > { %v472_v43 = vpop.permute.xlu0 %471 }
 0x167   : > { %v462_v51 = vadd.f32 %v460_v42, %v440_v40  ;;  %v463_v56 = vadd.f32 %v461_v44, %v441_v41  ;;  %v475_v8 = vsel %vm279_vm7, %v472_v43, %v474_v45  ;;  %v476_v49 = vsel %vm279_vm7, %v474_v45, %v472_v43 }
 0x168   : > { %v477_v57 = vsel %vm1173_vm10, %v475_v8, 0.0  ;;  %v478_v58 = vsel %vm1096_vm8, %v476_v49, 0.0 }
 0x169   : > { %v468_v63 = vadd.f32 %v466_v47, %v462_v51  ;;  %v469_v1 = vadd.f32 %v467_v46, %v463_v56  ;;  %v480_v3 = vmul.f32 %v479_v50, %v477_v57  ;;  %v481_v2 = vmul.f32 %v479_v50, %v478_v58 }
 0x16b   : > { %v482_v4 = vadd.f32 %v480_v3, %v468_v63  ;;  %v483_v5 = vadd.f32 %v481_v2, %v469_v1 }
 0x16d   : > { %v484_v6 = vmax.f32 %v482_v4, 0.0  ;;  %v485_v24 = vmax.f32 %v483_v5, 0.0 }
 0x16f   : > { %v638_v27 = vmul.f32 -1.442695, %v484_v6  ;;  %v639_v61 = vmul.f32 -1.442695, %v485_v24 }
 0x171   : > { %709 = vpow2.f32 %v638_v27 }
 0x172   : > { %711 = vpow2.f32 %v639_v61 }
 0x17b   : > { %v710_v33 = vpop.eup %709 }
 0x17c   : > { %v712_v12 = vpop.eup %711  ;;  %v492_v62 = vadd.f32 1.0, %v710_v33 }
 0x17d   : > { %v493_v53 = vadd.f32 1.0, %v712_v12 }
 0x17e   : > { %713 = vrcp.f32 %v492_v62 }
 0x17f   : > { %715 = vrcp.f32 %v493_v53 }
 0x188   : > { %v714_v7 = vpop.eup %713 }
 0x189   : > { %v716_v9 = vpop.eup %715  ;;  %v501_v10 = vrot.slane %v714_v7, %v500_v54 }
 0x18a   : > { %v505_v11 = vrot.slane %v716_v9, %v500_v54 }
 0x18c   : > { %v508_v13 = vcombine.low %v501_v10, %v505_v11 }
 0x18e   : > { %v510_v14 = vmul.f32 %v508_v13, %v1013_v0 }
 0x190   : > { %511 = vst [vmem:[%s171_s28] sm:$0xff] %v510_v14 }
 0x191   : > { %773 = shalt.err (!%p770_p0)
}
 0x192   : > { %s774_s19 = scalar_lea.hbm %s1328_s4, 128  ;;  %s778_s15 = scalar_lea.hbm %s1374_s2, 256 }
 0x193   : > { %p775_p3 = scmp.ne.s32.totalorder %s1328_s4, %s774_s19  ;;  %p779_p6 = scmp.lt.u32.totalorder %s1328_s4, %s1374_s2 }
 0x194   : > { %p780_p13 = scmp.lt.u32.totalorder %s778_s15, %s774_s19  ;;  %p782_p8 = scmp.lt.u32.totalorder %s774_s19, %s1328_s4 }
 0x195   : > { %p776_p7 = pnand %p775_p3, %p1397_p9 }
 0x196   : > { %p781_p4 = por %p780_p13, %p779_p6 }
 0x197   : > { %p777_p10 = pneg %p776_p7 }
 0x198   : > { %p783_p11 = por %p782_p8, %p781_p4 }
 0x19a   : > { %p784_p5 = pnand %p783_p11, %p777_p10 }
 0x19c   : > { %787 = shalt.err (!%p784_p5)
}
 0x19d   : > { %653 = dma.vmem_to_hbm [thread:$0]  (%p1397_p9), %s1330_s29, 128, %s1328_s4, %s513_s7  }
 0x19e PF: > { %s539_s24 = sand.u32 1, %s818_s9   ;;  %p1398_p1 = scmp.ne.s32.totalorder %s1379_s16, 0 }
 0x19f   : > { %p1399_p2 = scmp.ge.s32.totalorder %s830_s12, 2  ;;  %s540_s25 = scalar_lea.sflag [#allocation4], %s539_s24 }
 0x1a1   : > { %p664_p12 = pnand %p1399_p2, %p1398_p1 }
 0x1a3   : > { %813 = dma.done.wait (!%p664_p12), %s540_s25, 128  }
 0x1a4   : > { %815 = vsyncadd (!%p664_p12), %s540_s25, 4294967168  ;;  %p16_p0 = scmp.ge.s32.totalorder %s900_s18, 4   ;;  %s1400_s9 = smov %s822_s10 }
 0x1a5   : > { %s1401_s10 = smov %s826_s11  ;;  %s1402_s11 = smov %s940_s5 }
 0x1a6   : > { %s1403_s12 = smov %s900_s18  ;;  %18 = sbr.rel (!%p16_p0) target bundleno = 6 (0x6), region = 78 }
 0x1ad   :  { %545 = vsyncpa [#allocation3], 1 }
 0x1ae   :  { %547 = vsyncpa [#allocation3 + $0x1], 1 }
 0x1af   :  { %548 = vsyncpa [#allocation4], 1 }
 0x1b0   :  { %550 = vsyncpa [#allocation4 + $0x1], 1 }
 0x1b1   :  { %551 = vsyncpa [#allocation5], 1 }
 0x1b2   :  { %553 = vsyncpa [#allocation5 + $0x1], 1 }

</bundles_post_ra>
